<compile_context>
chip_gen: v7x
topology: tpu7x:2x2x1
jax: 0.10.0
libtpu: 0.0.40
codegen_flags: <defaults>
</compile_context>

<pallas_src>
import functools
import math

import jax
import jax.numpy as jnp
from jax.experimental import pallas as pl
from jax.experimental.pallas import tpu as pltpu

SMEM = pltpu.MemorySpace.SMEM

_VMEM_LIMIT = 64 * 1024 * 1024


def _cparams(*sems):
    return pltpu.CompilerParams(dimension_semantics=sems,
                                vmem_limit_bytes=_VMEM_LIMIT)


def _round_up(x, m):
    return ((x + m - 1) // m) * m


def _pick_t_tile(T):
    for t in (512, 256, 128, 64, 32, 16, 8):
        if T % t == 0:
            return t
    return T


# --------------------------------------------------------------------------
# Pallas kernels
# --------------------------------------------------------------------------

def _add_pos_kernel(x_ref, pe_ref, alpha_ref, o_ref):
    # o = x + alpha * pe      (dropout == identity in eval mode)
    o_ref[...] = x_ref[...] + alpha_ref[0] * pe_ref[...]


def add_positional(x, pe, alpha):
    B, T, Hp = x.shape
    return pl.pallas_call(
        _add_pos_kernel,
        out_shape=jax.ShapeDtypeStruct(x.shape, x.dtype),
        grid=(B,),
        in_specs=[pl.BlockSpec((1, T, Hp), lambda b: (b, 0, 0)),
                  pl.BlockSpec((T, Hp), lambda b: (0, 0)),
                  pl.BlockSpec(memory_space=SMEM)],
        out_specs=pl.BlockSpec((1, T, Hp), lambda b: (b, 0, 0)),
        compiler_params=_cparams("parallel"),
    )(x, pe[:T], alpha)


def _linear_kernel(x_ref, w_ref, b_ref, o_ref):
    # bf16 operands, f32 accumulation.
    y = jnp.dot(x_ref[...].astype(jnp.bfloat16), w_ref[...],
                preferred_element_type=jnp.float32) + b_ref[...]
    o_ref[...] = y.astype(o_ref.dtype)


def linear(x2d, w, b, tm=512):
    """x2d: (M, K) f32, w: (K, N) bf16, b: (N,) f32 -> (M, N) f32."""
    M, K = x2d.shape
    N = w.shape[1]
    tm = min(tm, M)
    return pl.pallas_call(
        _linear_kernel,
        out_shape=jax.ShapeDtypeStruct((M, N), x2d.dtype),
        grid=(pl.cdiv(M, tm),),
        in_specs=[pl.BlockSpec((tm, K), lambda i: (i, 0)),
                  pl.BlockSpec((K, N), lambda i: (0, 0)),
                  pl.BlockSpec((1, N), lambda i: (0, 0))],
        out_specs=pl.BlockSpec((tm, N), lambda i: (i, 0)),
        compiler_params=_cparams("parallel"),
    )(x2d, w, b.reshape(1, N))


def _attn_block_kernel(x_ref, mrow_ref, mcol_ref, wqkv_ref, bqkv_ref,
                       wo_ref, bo_ref, g_ref, be_ref, o_ref, attn_ref,
                       *, n_heads, dhp, h_true, scale, eps):
    # One batch element per grid step.  Fully fused:
    # QKV proj -> masked MHA -> out proj -> residual -> SCLN -> frame mask.
    x = x_ref[0]                                            # (T, Hp) f32
    T, Hp = x.shape
    xb = x.astype(jnp.bfloat16)

    qkv = jnp.dot(xb, wqkv_ref[...],
                  preferred_element_type=jnp.float32) + bqkv_ref[...]   # (T, 3*nH*dhp)

    bias = (1.0 - mrow_ref[0]) * (-1e9)                     # (1, T) key-padding bias

    acc = jnp.zeros((T, Hp), jnp.float32)
    for h in range(n_heads):                                # static, 128-aligned slices
        q = qkv[:, h * dhp:(h + 1) * dhp].astype(jnp.bfloat16)
        k = qkv[:, (n_heads + h) * dhp:(n_heads + h + 1) * dhp].astype(jnp.bfloat16)
        v = qkv[:, (2 * n_heads + h) * dhp:(2 * n_heads + h + 1) * dhp].astype(jnp.bfloat16)
        # scores: contract last dims (no explicit k transpose)
        s = jax.lax.dot_general(q, k, (((1,), (1,)), ((), ())),
                                preferred_element_type=jnp.float32)
        s = s * scale + bias
        m = jnp.max(s, axis=-1, keepdims=True)
        p = jnp.exp(s - m)
        p = p / jnp.sum(p, axis=-1, keepdims=True)          # exact softmax
        attn_ref[0, h] = p.astype(attn_ref.dtype)
        ctx = jnp.dot(p.astype(jnp.bfloat16), v,
                      preferred_element_type=jnp.float32)    # (T, dhp)
        # fold the output projection into the head loop -> no concat/head-merge
        acc = acc + jnp.dot(ctx.astype(jnp.bfloat16),
                            wo_ref[h * dhp:(h + 1) * dhp, :],
                            preferred_element_type=jnp.float32)

    z = x + acc + bo_ref[...]
    # SCLN: padded channels of z are exactly zero -> divide by true H.
    inv_h = 1.0 / h_true
    mu = jnp.sum(z, axis=-1, keepdims=True) * inv_h
    var = jnp.maximum(jnp.sum(z * z, axis=-1, keepdims=True) * inv_h - mu * mu, 0.0)
    zn = (z - mu) * jax.lax.rsqrt(var + eps)
    y = g_ref[0] * zn + be_ref[0]
    o_ref[0] = (y * mcol_ref[0]).astype(o_ref.dtype)


def attn_block(x, mask_row, mask_col, p, gamma, beta, dims, eps=1e-5):
    B, T, Hp = x.shape
    nH, dhp, dh, H = dims['n_heads'], dims['dhp'], dims['dh'], dims['H']
    W3 = 3 * nH * dhp
    kern = functools.partial(_attn_block_kernel, n_heads=nH, dhp=dhp,
                             h_true=float(H), scale=1.0 / math.sqrt(dh), eps=eps)
    return pl.pallas_call(
        kern,
        out_shape=(jax.ShapeDtypeStruct((B, T, Hp), x.dtype),
                   jax.ShapeDtypeStruct((B, nH, T, T), jnp.float32)),
        grid=(B,),
        in_specs=[pl.BlockSpec((1, T, Hp), lambda b: (b, 0, 0)),
                  pl.BlockSpec((1, 1, T), lambda b: (b, 0, 0)),
                  pl.BlockSpec((1, T, 1), lambda b: (b, 0, 0)),
                  pl.BlockSpec((Hp, W3), lambda b: (0, 0)),
                  pl.BlockSpec((1, W3), lambda b: (0, 0)),
                  pl.BlockSpec((nH * dhp, Hp), lambda b: (0, 0)),
                  pl.BlockSpec((1, Hp), lambda b: (0, 0)),
                  pl.BlockSpec((1, 1, Hp), lambda b: (b, 0, 0)),
                  pl.BlockSpec((1, 1, Hp), lambda b: (b, 0, 0))],
        out_specs=(pl.BlockSpec((1, T, Hp), lambda b: (b, 0, 0)),
                   pl.BlockSpec((1, nH, T, T), lambda b: (b, 0, 0, 0))),
        compiler_params=_cparams("parallel"),
    )(x, mask_row, mask_col, p['w_qkv'], p['b_qkv'].reshape(1, W3),
      p['wo'], p['bo'].reshape(1, Hp), gamma, beta)


def _ffn_block_kernel(x_ref, w1_ref, b1_ref, w2_ref, b2_ref, g_ref, be_ref,
                      m_ref, o_ref, *, h_true, eps):
    # relu(x@W1+b1)@W2+b2 (intermediate stays in VMEM) + residual + SCLN + mask.
    x = x_ref[0]                                            # (tq, Hp) f32
    h = jnp.dot(x.astype(jnp.bfloat16), w1_ref[...],
                preferred_element_type=jnp.float32) + b1_ref[...]
    h = jnp.maximum(h, 0.0)
    y = jnp.dot(h.astype(jnp.bfloat16), w2_ref[...],
                preferred_element_type=jnp.float32) + b2_ref[...]
    z = x + y
    inv_h = 1.0 / h_true
    mu = jnp.sum(z, axis=-1, keepdims=True) * inv_h
    var = jnp.maximum(jnp.sum(z * z, axis=-1, keepdims=True) * inv_h - mu * mu, 0.0)
    zn = (z - mu) * jax.lax.rsqrt(var + eps)
    o_ref[0] = ((g_ref[0] * zn + be_ref[0]) * m_ref[0]).astype(o_ref.dtype)


def ffn_block(x, p, gamma, beta, mask_col, H, eps=1e-5):
    B, T, Hp = x.shape
    Fp = p['w1'].shape[1]
    tq = _pick_t_tile(T)
    nT = T // tq
    kern = functools.partial(_ffn_block_kernel, h_true=float(H), eps=eps)
    return pl.pallas_call(
        kern,
        out_shape=jax.ShapeDtypeStruct((B, T, Hp), x.dtype),
        grid=(B, nT),
        in_specs=[pl.BlockSpec((1, tq, Hp), lambda b, t: (b, t, 0)),
                  pl.BlockSpec((Hp, Fp), lambda b, t: (0, 0)),
                  pl.BlockSpec((1, Fp), lambda b, t: (0, 0)),
                  pl.BlockSpec((Fp, Hp), lambda b, t: (0, 0)),
                  pl.BlockSpec((1, Hp), lambda b, t: (0, 0)),
                  pl.BlockSpec((1, 1, Hp), lambda b, t: (b, 0, 0)),
                  pl.BlockSpec((1, 1, Hp), lambda b, t: (b, 0, 0)),
                  pl.BlockSpec((1, tq, 1), lambda b, t: (b, t, 0))],
        out_specs=pl.BlockSpec((1, tq, Hp), lambda b, t: (b, t, 0)),
        compiler_params=_cparams("parallel", "parallel"),
    )(x, p['w1'], p['b1'].reshape(1, Fp), p['w2'], p['b2'].reshape(1, Hp),
      gamma, beta, mask_col)


# --------------------------------------------------------------------------
# Parameter construction (deterministic, in-script, lane-dense padded, bf16)
# --------------------------------------------------------------------------

def positional_encoding(max_len, d_model):
    pos = jnp.arange(max_len, dtype=jnp.float32)[:, None]
    div = jnp.exp(jnp.arange(0, d_model, 2, dtype=jnp.float32) *
                  (-math.log(10000.0) / d_model))
    pe = jnp.zeros((max_len, d_model), jnp.float32)
    pe = pe.at[:, 0::2].set(jnp.sin(pos * div))
    pe = pe.at[:, 1::2].set(jnp.cos(pos * div))
    return pe


def _w(key, shape, scale=0.02):
    return scale * jax.random.normal(key, shape, jnp.float32)


def _padded(w, out_shape):
    return jnp.pad(w, [(0, o - s) for s, o in zip(w.shape, out_shape)])


def init_decoder_params(key, hp, max_len=256):
    H, F, S, M = hp['hidden_dim'], hp['decoder_ffn_dim'], hp['style_dim'], hp['n_mels']
    nH = hp['decoder_attn_n_heads']
    n_layers = hp['decoder_attn_n_layers']
    dh = H // nH
    Hp, Fp, Mp, dhp = (_round_up(H, 128), _round_up(F, 128),
                       _round_up(M, 128), _round_up(dh, 128))

    layers, style_ws, style_bs = [], [], []
    for _ in range(n_layers):
        key, *ks = jax.random.split(key, 13)
        wq, wk, wv = _w(ks[0], (H, H)), _w(ks[1], (H, H)), _w(ks[2], (H, H))
        # fused QKV, head-major 128-aligned column slots: [q_h..., k_h..., v_h...]
        cols = []
        for w in (wq, wk, wv):
            for h in range(nH):
                cols.append(_padded(w[:, h * dh:(h + 1) * dh], (Hp, dhp)))
        w_qkv = jnp.concatenate(cols, axis=1).astype(jnp.bfloat16)   # (Hp, 3*nH*dhp)
        wo = _w(ks[3], (H, H))
        wo_p = jnp.concatenate(
            [_padded(wo[h * dh:(h + 1) * dh, :], (dhp, Hp)) for h in range(nH)],
            axis=0).astype(jnp.bfloat16)                             # (nH*dhp, Hp)
        layers.append(dict(
            w_qkv=w_qkv, b_qkv=jnp.zeros((3 * nH * dhp,), jnp.float32),
            wo=wo_p, bo=jnp.zeros((Hp,), jnp.float32),
            w1=_padded(_w(ks[6], (H, F)), (Hp, Fp)).astype(jnp.bfloat16),
            b1=jnp.zeros((Fp,), jnp.float32),
            w2=_padded(_w(ks[7], (F, H)), (Fp, Hp)).astype(jnp.bfloat16),
            b2=jnp.zeros((Hp,), jnp.float32),
        ))
        # style-conditioning linears (gamma1, beta1, gamma2, beta2), fused across layers
        for kw in (ks[4], ks[5], ks[8], ks[9]):
            style_ws.append(_padded(_w(kw, (S, H)), (S, Hp)))
        gamma_bias = jnp.concatenate([jnp.ones((H,), jnp.float32),
                                      jnp.zeros((Hp - H,), jnp.float32)])
        style_bs += [gamma_bias, jnp.zeros((Hp,), jnp.float32),
                     gamma_bias, jnp.zeros((Hp,), jnp.float32)]

    key, ko = jax.random.split(key)
    return dict(
        pe=_padded(positional_encoding(max_len, H), (max_len, Hp)),
        alpha=jnp.ones((1,), jnp.float32),
        layers=layers,
        style_w=jnp.concatenate(style_ws, axis=1).astype(jnp.bfloat16),  # (S, 4*Hp*L)
        style_b=jnp.concatenate(style_bs, axis=0).astype(jnp.float32),
        out_w=_padded(_w(ko, (H, M)), (Hp, Mp)).astype(jnp.bfloat16),
        out_b=jnp.zeros((Mp,), jnp.float32),
        dims=dict(H=H, Hp=Hp, dh=dh, dhp=dhp, F=F, Fp=Fp, M=M, Mp=Mp, n_heads=nH),
    )


# --------------------------------------------------------------------------
# Forward pass
# --------------------------------------------------------------------------

def decoder_forward(params, x, style_embedding, x_mask):
    dims = params['dims']
    B, T, H = x.shape
    Hp = dims['Hp']
    n_layers = len(params['layers'])

    # pad channel dim once (padded channels stay exactly zero through all layers)
    xp = jnp.pad(x, ((0, 0), (0, 0), (0, Hp - H)))
    xp = add_positional(xp, params['pe'], params['alpha'])   # x + alpha*pe (+dropout=id)

    # all layers' (gamma1, beta1, gamma2, beta2) in ONE matmul
    sproj = linear(style_embedding, params['style_w'], params['style_b'])
    sproj = sproj.reshape(B, n_layers, 4, Hp)

    mask_row = x_mask.reshape(B, 1, T)    # lane-dense key-padding mask
    mask_col = x_mask.reshape(B, T, 1)    # per-frame output mask

    dec_attns = []
    for li, p in enumerate(params['layers']):
        g1 = sproj[:, li, 0].reshape(B, 1, Hp)
        b1 = sproj[:, li, 1].reshape(B, 1, Hp)
        g2 = sproj[:, li, 2].reshape(B, 1, Hp)
        b2 = sproj[:, li, 3].reshape(B, 1, Hp)
        xp, attn = attn_block(xp, mask_row, mask_col, p, g1, b1, dims)
        xp = ffn_block(xp, p, g2, b2, mask_col, dims['H'])
        dec_attns.append(attn)

    out = linear(xp.reshape(B * T, Hp), params['out_w'], params['out_b'])
    out = out.reshape(B, T, -1)[:, :, :dims['M']]            # strip mel padding
    return out, dec_attns


# --------------------------------------------------------------------------
if __name__ == "__main__":
    hp = dict(
        decoder_attn_n_layers=2,
        decoder_attn_n_heads=2,
        hidden_dim=32,
        n_mels=20,
        decoder_dropout=0.1,
        decoder_ffn_dim=64,
        style_dim=16,
    )
    B, T = 2, 8

    key = jax.random.PRNGKey(0)
    kx, ks, kp = jax.random.split(key, 3)
    x = jax.random.normal(kx, (B, T, hp['hidden_dim']), jnp.float32)
    style = jax.random.normal(ks, (B, hp['style_dim']), jnp.float32)
    x_mask = jnp.ones((B, T), jnp.float32).at[1, 6:].set(0.0)    # 2nd sequence padded

    params = init_decoder_params(kp, hp, max_len=64)

    out, dec_attns = decoder_forward(params, x, style, x_mask)
    jax.block_until_ready(out)
    for a in dec_attns:
        jax.block_until_ready(a)

    assert out.shape == (B, T, hp['n_mels'])
    assert len(dec_attns) == hp['decoder_attn_n_layers']
    assert dec_attns[0].shape == (B, hp['decoder_attn_n_heads'], T, T)
    print("KERNEL_OK")
</pallas_src>

<mosaic_0001>
module attributes {stable_mosaic.version = 11 : i64} {
  func.func @_add_pos_kernel(%arg0: i32, %arg1: memref<1x8x128xf32, #tpu.memory_space<vmem>>, %arg2: memref<8x128xf32, #tpu.memory_space<vmem>>, %arg3: memref<1xf32, #tpu.memory_space<smem>>, %arg4: memref<1x8x128xf32, #tpu.memory_space<vmem>>) attributes {dimension_semantics = [#tpu.dimension_semantics<parallel>], iteration_bounds = array<i64: 2>, scalar_prefetch = 0 : i64, scratch_operands = 0 : i64, tpu.core_type = #tpu.core_type<tc>, window_params = [{transform_indices = @transform_0, window_bounds = array<i64: 1, 8, 128>}, {pipeline_mode = #tpu.pipeline_mode<synchronous>, transform_indices = @transform_1, window_bounds = array<i64: 8, 128>}, {transform_indices = @transform_2, window_bounds = array<i64: 1>}, {transform_indices = @transform_3, window_bounds = array<i64: 1, 8, 128>}]} {
    %c0 = arith.constant 0 : index
    %c0_0 = arith.constant 0 : index
    %c0_1 = arith.constant 0 : index
    %0 = vector.load %arg1[%c0, %c0_0, %c0_1] : memref<1x8x128xf32, #tpu.memory_space<vmem>>, vector<1x8x128xf32>
    %c0_2 = arith.constant 0 : index
    %1 = memref.load %arg3[%c0_2] : memref<1xf32, #tpu.memory_space<smem>>
    %c0_3 = arith.constant 0 : index
    %c0_4 = arith.constant 0 : index
    %2 = vector.load %arg2[%c0_3, %c0_4] : memref<8x128xf32, #tpu.memory_space<vmem>>, vector<8x128xf32>
    %3 = vector.broadcast %1 : f32 to vector<8x128xf32>
    %4 = arith.mulf %3, %2 : vector<8x128xf32>
    %5 = vector.shape_cast %4 : vector<8x128xf32> to vector<1x8x128xf32>
    %6 = arith.addf %0, %5 : vector<1x8x128xf32>
    %c0_5 = arith.constant 0 : index
    %c0_6 = arith.constant 0 : index
    %c0_7 = arith.constant 0 : index
    %7 = vector.load %arg4[%c0_5, %c0_6, %c0_7] : memref<1x8x128xf32, #tpu.memory_space<vmem>>, vector<1x8x128xf32>
    tpu.vector_store %arg4[%c0_5, %c0_6, %c0_7], %6 {strides = array<i32>} : memref<1x8x128xf32, #tpu.memory_space<vmem>>, vector<1x8x128xf32>,
    return
  }
  func.func @transform_0(%arg0: i32) -> (i32, i32, i32) {
    %c0_i32 = arith.constant 0 : i32
    %c0_i32_0 = arith.constant 0 : i32
    %c0_i32_1 = arith.constant 0 : i32
    return %arg0, %c0_i32, %c0_i32_0 : i32, i32, i32
  }
  func.func @transform_1(%arg0: i32) -> (i32, i32) {
    %c0_i32 = arith.constant 0 : i32
    %c0_i32_0 = arith.constant 0 : i32
    %c0_i32_1 = arith.constant 0 : i32
    return %c0_i32, %c0_i32_0 : i32, i32
  }
  func.func @transform_2(%arg0: i32) -> i32 {
    %c0_i32 = arith.constant 0 : i32
    %c0_i32_0 = arith.constant 0 : i32
    return %c0_i32 : i32
  }
  func.func @transform_3(%arg0: i32) -> (i32, i32, i32) {
    %c0_i32 = arith.constant 0 : i32
    %c0_i32_0 = arith.constant 0 : i32
    %c0_i32_1 = arith.constant 0 : i32
    return %arg0, %c0_i32, %c0_i32_0 : i32, i32, i32
  }
}

</mosaic_0001>

<bundles_post_ra>
// kernel: tpu_custom_call.1
= control target key start
LH: loop header
LB: loop body
LE: loop exit
PB: predicated region body
PF: predicated region fallthrough
CT: control target
= control target key end

     0   :  { %s729_s0 = inlined_call_operand.hbm [shape: f32[2,8,128], index: 0, kind: input, shape index: {}]   ;;  %s730_s1 = inlined_call_operand.hbm [shape: f32[8,128], index: 1, kind: input, shape index: {}]   ;;  %s731_s2 = inlined_call_operand.<no memory space> [shape: f32[1], index: 2, kind: input, shape index: {}]   ;;  %s732_s3 = inlined_call_operand.hbm [shape: f32[2,8,128], index: 3, kind: output, shape index: {}]  }
   0x1   :  { %8 = sst [smem:[#allocation2]] %s731_s2 }
   0x2   :  { %9 = vsyncpa [#allocation4], 0 }
   0x3   :  { %11 = vsyncpa [#allocation4 + $0x1], 0 }
   0x4   :  { %12 = vsyncpa [#allocation7], 0 }
   0x5   :  { %13 = vsyncpa [#allocation5], 0 }
   0x6   :  { %15 = vsyncpa [#allocation5 + $0x1], 0  ;;  %s528_s14 = smov 0   ;;  %s530_s15 = smov 0  }
   0x7   :  { %s532_s16 = smov 0   ;;  %s534_s17 = smov 0  }
   0x8 LB: > { %s549_s2 = sadd.s32 4294967295, %s500_s17   ;;  %s301_s18 = sadd.s32 4294967294, %s500_s17   ;;  %s500_s17 = sphi %s534_s17, %s756_s17   ;;  %s496_s16 = sphi %s532_s16, %s755_s16   ;;  %s492_s15 = sphi %s530_s15, %s754_s15   ;;  %s488_s14 = sphi %s528_s14, %s753_s14  }
   0x9   : > { %p41_p0 = scmp.ne.s32.totalorder %s492_s15, %s488_s14  ;;  %p733_p1 = scmp.eq.s32.totalorder %s549_s2, 0 }
   0xa   : > { %p113_p3 = scmp.eq.s32.totalorder %s301_s18, 1  ;;  %p302_p5 = scmp.ge.s32.totalorder %s500_s17, 1 }
   0xb   : > { %p558_p4 = por %p733_p1, %p41_p0  ;;  %p120_p7 = scmp.lt.s32.totalorder %s500_s17, 3 }
   0xc   : > { %p563_p6 = por %p113_p3, %p41_p0  ;;  %s502_s22 = smov [#allocation6]  }
   0xd   : > { %s736_s19 = scalar_select %p558_p4, 1, 0 }
   0xe   : > { %s737_s20 = scalar_select %p563_p6, 1, 0 }
   0xf   : > { %p568_p8 = pnand %p302_p5, %p120_p7  ;;  %s133_s23 = sshll.u32 %s502_s22, 4  ;;  %s134_s23 = int_to_ptr.vmem [resolvable:$true] %s133_s23 }
  0x10   : > { %s576_s24 = sadd.s32 1, %s500_s17   ;;  %s28_s28 = sadd.s32 1, %s496_s16 }
  0x11   : > { %s738_s21 = scalar_select %p568_p8, 1, 0 }
  0x12   : > { %p323_p10 = pneg %p568_p8  ;;  %s25_s26 = ssub.s32 %s500_s17, %s576_s24 }
  0x13   : > { %p586_p12 = scmp.eq.s32.totalorder %s25_s26, 0  ;;  %s372_s4 = scalar_lea.hbm %s730_s1, 128 }
  0x14   : > { %p580_p11 = pnand %p323_p10, %p733_p1  ;;  %p373_p0 = scmp.ne.s32.totalorder %s730_s1, %s372_s4 }
  0x15   : > { %s740_s27 = scalar_select %p586_p12, 1, 0 }
  0x16   : > { %p374_p3 = pneg %p580_p11  ;;  %p379_p10 = scmp.lt.u32.totalorder %s372_s4, %s730_s1 }
  0x18   : > { %p375_p5 = pnand %p374_p3, %p373_p0 }
  0x1a   : > { %p376_p7 = pneg %p375_p5 }
  0x1c   : > { %p381_p9 = pnand %p379_p10, %p376_p7 }
  0x1e   : > { %384 = shalt.err (!%p381_p9)
}
  0x1f   : > { %s385_s9 = scalar_lea.vmem %s134_s23, 128  ;;  %p393_p6 = scmp.lt.s32.totalorder %s134_s23, %s134_s23 }
  0x20   : > { %p386_p1 = scmp.ne.s32.totalorder %s134_s23, %s385_s9  ;;  %p394_p4 = scmp.lt.s32.totalorder %s385_s9, %s385_s9 }
  0x22   : > { %p388_p2 = pnand %p386_p1, %p374_p3  ;;  %p395_p8 = por %p394_p4, %p393_p6 }
  0x24   : > { %p389_p13 = pneg %p388_p2 }
  0x26   : > { %p396_p12 = pnand %p395_p8, %p389_p13 }
  0x28   : > { %399 = shalt.err (!%p396_p12)
}
  0x29   : > { %326 = dma.hbm_to_vmem [thread:$0]  (!%p580_p11), %s730_s1, 128, %s134_s23, [#allocation7]  }
  0x2a   : > { %p741_p1 = scmp.ne.s32.totalorder %s740_s27, 0  ;;  %p36_p2 = scmp.eq.s32.totalorder %s500_s17, 0 }
  0x2b   : > { %p742_p4 = scmp.ne.s32.totalorder %s496_s16, %s492_s15  ;;  %p743_p6 = scmp.eq.s32.totalorder %s549_s2, 1 }
  0x2c   : > { %s612_s12 = scalar_select %p741_p1, %s496_s16, %s28_s28  }
  0x2d   : > { %p620_p8 = por %p743_p6, %p742_p4  ;;  %p336_p9 = scmp.lt.s32.totalorder %s500_s17, 2 }
  0x2e   : > { %s147_s18 = sand.u32 1, %s496_s16   ;;  %p745_p12 = pmov %p742_p4 }
  0x2f   : > { %s305_s22 = sshll.u32 %s147_s18, 3  ;;  %s306_s25 = sshll.u32 %s500_s17, 7 }
  0x30   : > { %p37_p13 = por %p36_p2, %p745_p12  ;;  %s633_s23 = scalar_lea.hbm %s729_s0, %s306_s25 }
  0x31   : > { %s151_s27 = scalar_lea.vmem [#allocation3], %s305_s22  ;;  %s148_s4 = scalar_lea.sflag [#allocation4], %s147_s18 }
  0x32   : > { %s158_s28 = sshll.u32 %s151_s27, 4  ;;  %p635_p11 = pnand %p336_p9, %p37_p13  ;;  %s639_s28 = int_to_ptr.vmem [resolvable:$true] %s158_s28 }
  0x33   : > { %s400_s5 = scalar_lea.hbm %s633_s23, 128  ;;  %s405_s8 = scalar_lea.hbm %s729_s0, 256 }
  0x34   : > { %p401_p0 = scmp.ne.s32.totalorder %s633_s23, %s400_s5  ;;  %p402_p3 = pneg %p635_p11 }
  0x35   : > { %p406_p10 = scmp.lt.u32.totalorder %s633_s23, %s729_s0  ;;  %p407_p1 = scmp.lt.u32.totalorder %s405_s8, %s400_s5 }
  0x36   : > { %p403_p5 = pnand %p402_p3, %p401_p0  ;;  %p409_p4 = scmp.lt.u32.totalorder %s400_s5, %s633_s23 }
  0x37   : > { %p408_p2 = por %p407_p1, %p406_p10 }
  0x38   : > { %p404_p7 = pneg %p403_p5 }
  0x39   : > { %p410_p6 = por %p409_p4, %p408_p2 }
  0x3b   : > { %p411_p9 = pnand %p410_p6, %p404_p7 }
  0x3d   : > { %414 = shalt.err (!%p411_p9)
}
  0x3e   : > { %s415_s11 = scalar_lea.vmem %s639_s28, 128  ;;  %s503_s18 = smov [#allocation3]  }
  0x3f   : > { %p416_p12 = scmp.ne.s32.totalorder %s639_s28, %s415_s11  ;;  %s420_s22 = sshll.u32 %s503_s18, 4  ;;  %s421_s22 = int_to_ptr.vmem [resolvable:$false] %s420_s22 }
  0x40   : > { %s422_s25 = scalar_lea.vmem %s421_s22, 256  ;;  %p423_p5 = scmp.lt.s32.totalorder %s639_s28, %s421_s22 }
  0x41   : > { %p418_p13 = pnand %p416_p12, %p402_p3  ;;  %p424_p10 = scmp.lt.s32.totalorder %s422_s25, %s415_s11 }
  0x43   : > { %p419_p0 = pneg %p418_p13  ;;  %p425_p1 = por %p424_p10, %p423_p5 }
  0x45   : > { %p426_p2 = pnand %p425_p1, %p419_p0 }
  0x47   : > { %429 = shalt.err (!%p426_p2)
}
  0x48   : > { %330 = dma.hbm_to_vmem [thread:$0]  (!%p635_p11), %s633_s23, 128, %s639_s28, %s148_s4  }
  0x49   : > { %p747_p7 = scmp.ne.s32.totalorder %s738_s21, 0 }
  0x4a   : > { %s669_s26 = sand.u32 (!%p747_p7), 1, %s492_s15   ;;  %p748_p3 = scmp.ne.s32.totalorder (!%p747_p7), %s736_s19, 0 }
  0x4b   : > { %167 = sbr.rel (%p747_p7) target bundleno = 111 (0x6f), region = 32  ;;  %s308_s29 = sshll.u32 (!%p747_p7), %s669_s26, 3 }
  0x4c   : > { %s170_s27 = scalar_lea.sflag (!%p747_p7), [#allocation4], %s669_s26  ;;  %s173_s5 = scalar_lea.vmem (!%p747_p7), [#allocation3], %s308_s29 }
  0x52   : > { %475 = dma.done.wait (%p748_p3), %s170_s27, 128  }
  0x53   : > { %477 = vsyncadd (%p748_p3), %s170_s27, 4294967168  ;;  %p749_p4 = scmp.eq.s32.totalorder %s549_s2, 0 }
  0x55   : > { %479 = dma.done.wait (%p749_p4), [#allocation7], 128   ;;  %p750_p11 = pmov %p749_p4 }
  0x56   : > { %s201_s21 = sld [smem:[#allocation2]]  ;;  %v200_v0 = vld [vmem:[%s173_s5] sm:$0xff]  ;;  %v202_v1 = vld [vmem:[#allocation6] sm:$0xff]  ;;  %s199_s23 = scalar_lea.vmem [#allocation8], %s308_s29 }
  0x57   : > { %481 = vsyncadd (%p750_p11), [#allocation7], 4294967168  ;;  %s221_s28 = sshll.u32 %s199_s23, 4  ;;  %s312_s30 = sshll.u32 %s549_s2, 7  ;;  %s682_s28 = int_to_ptr.vmem [resolvable:$true] %s221_s28 }
  0x58   : > { %s687_s6 = scalar_lea.hbm %s732_s3, %s312_s30  ;;  %s208_s7 = scalar_lea.sflag [#allocation5], %s669_s26 }
  0x59   : > { %s430_s8 = scalar_lea.vmem %s682_s28, 128  ;;  %s504_s2 = smov [#allocation8]  }
  0x5a   : > { %p431_p6 = scmp.ne.s32.totalorder %s682_s28, %s430_s8  ;;  %s434_s9 = sshll.u32 %s504_s2, 4  ;;  %s435_s9 = int_to_ptr.vmem [resolvable:$false] %s434_s9 }
  0x5b   : > { %s436_s10 = scalar_lea.vmem %s435_s9, 256  ;;  %p437_p13 = scmp.lt.s32.totalorder %s682_s28, %s435_s9 }
  0x5c   : > { %v203_v2 = vstv %s201_s21  ;;  %p432_p9 = pnand %p431_p6, %p620_p8  ;;  %p438_p0 = scmp.lt.s32.totalorder %s436_s10, %s430_s8 }
  0x5d   : > { %v204_v3 = vmul.f32 %v203_v2, %v202_v1 }
  0x5e   : > { %p433_p12 = pneg %p432_p9  ;;  %p439_p5 = por %p438_p0, %p437_p13 }
  0x5f   : > { %v205_v4 = vadd.f32 %v204_v3, %v200_v0 }
  0x60   : > { %p440_p10 = pnand %p439_p5, %p433_p12 }
  0x61   : > { %206 = vst [vmem:[%s199_s23] sm:$0xff] %v205_v4 }
  0x62   : > { %443 = shalt.err (!%p440_p10)
}
  0x63   : > { %s444_s11 = scalar_lea.hbm %s687_s6, 128  ;;  %s448_s25 = scalar_lea.hbm %s732_s3, 256 }
  0x64   : > { %p445_p1 = scmp.ne.s32.totalorder %s687_s6, %s444_s11  ;;  %p449_p3 = scmp.lt.u32.totalorder %s687_s6, %s732_s3 }
  0x65   : > { %p450_p4 = scmp.lt.u32.totalorder %s448_s25, %s444_s11  ;;  %p452_p6 = scmp.lt.u32.totalorder %s444_s11, %s687_s6 }
  0x66   : > { %p446_p2 = pnand %p445_p1, %p620_p8 }
  0x67   : > { %p451_p11 = por %p450_p4, %p449_p3 }
  0x68   : > { %p447_p7 = pneg %p446_p2 }
  0x69   : > { %p453_p9 = por %p452_p6, %p451_p11 }
  0x6b   : > { %p454_p12 = pnand %p453_p9, %p447_p7 }
  0x6d   : > { %457 = shalt.err (!%p454_p12)
}
  0x6e   : > { %321 = dma.vmem_to_hbm [thread:$0]  (%p620_p8), %s682_s28, 128, %s687_s6, %s208_s7  }
  0x6f PF: > { %s233_s27 = sand.u32 1, %s488_s14   ;;  %p751_p13 = scmp.ne.s32.totalorder %s737_s20, 0 }
  0x70   : > { %p752_p0 = scmp.ge.s32.totalorder %s500_s17, 2  ;;  %s234_s5 = scalar_lea.sflag [#allocation5], %s233_s27 }
  0x72   : > { %p332_p5 = pnand %p752_p0, %p751_p13 }
  0x74   : > { %483 = dma.done.wait (!%p332_p5), %s234_s5, 128  }
  0x75   : > { %485 = vsyncadd (!%p332_p5), %s234_s5, 4294967168  ;;  %p18_p10 = scmp.ge.s32.totalorder %s576_s24, 4   ;;  %s753_s14 = smov %s492_s15 }
  0x76   : > { %s754_s15 = smov %s496_s16  ;;  %s755_s16 = smov %s612_s12 }
  0x77   : > { %s756_s17 = smov %s576_s24  ;;  %20 = sbr.rel (!%p18_p10) target bundleno = 8 (0x8), region = 81 }
  0x7e   :  { %239 = vsyncpa [#allocation4], 1 }
  0x7f   :  { %241 = vsyncpa [#allocation4 + $0x1], 1 }
  0x80   :  { %242 = vsyncpa [#allocation7], 1 }
  0x81   :  { %243 = vsyncpa [#allocation5], 1 }
  0x82   :  { %245 = vsyncpa [#allocation5 + $0x1], 1 }

</bundles_post_ra>
